<compile_context>
chip_gen: v6e
topology: v6e:2x2x1
jax: 0.10.0
libtpu: 0.0.40
codegen_flags: <defaults>
</compile_context>

<pallas_src>
import functools

import jax
import jax.numpy as jnp
from jax.experimental import pallas as pl
from jax.experimental.pallas import tpu as pltpu


def _channel_attention_kernel(x_ref, w1t_ref, w2t_ref, o_ref,
                              sum_acc, max_acc, *, hw_total):
    """One grid step.

    x_ref   : (Bn, C, Thw)  input tile (C on sublanes, HW on lanes)
    w1t_ref : (C, Cr)       first 1x1-conv weight, pre-transposed
    w2t_ref : (Cr, C)       second 1x1-conv weight, pre-transposed
    o_ref   : (Bn, 1, C)    sigmoid attention (lane-dense along C)
    sum_acc : (Bn, C) f32   running spatial sum   (VMEM scratch)
    max_acc : (Bn, C) f32   running spatial max   (VMEM scratch)
    """
    k = pl.program_id(1)
    nk = pl.num_programs(1)

    @pl.when(k == 0)
    def _init():
        sum_acc[...] = jnp.zeros_like(sum_acc)
        max_acc[...] = jnp.full_like(max_acc, -jnp.inf)

    x = x_ref[...]                                    # (Bn, C, Thw), input dtype
    bn, _, thw = x.shape

    if hw_total % thw != 0:
        # Last HW tile is padded: mask the tail out of both reductions.
        lane = jax.lax.broadcasted_iota(jnp.int32, (1, 1, thw), 2)
        valid = (k * thw + lane) < hw_total
        x_sum_in = jnp.where(valid, x, jnp.zeros_like(x))
        x_max_in = jnp.where(valid, x, jnp.full_like(x, -jnp.inf))
    else:
        x_sum_in = x
        x_max_in = x

    # Reduce over the lane (HW) axis; accumulate in f32, lane-dense (Bn, C).
    sum_acc[...] += jnp.sum(x_sum_in, axis=2, dtype=jnp.float32)
    max_acc[...] = jnp.maximum(max_acc[...],
                               jnp.max(x_max_in, axis=2).astype(jnp.float32))

    @pl.when(k == nk - 1)
    def _finalize():
        avg = sum_acc[...] * jnp.float32(1.0 / hw_total)       # (Bn, C)
        mx = max_acc[...]                                      # (Bn, C)
        # Batch avg/max descriptors of all Bn images into ONE matmul pair.
        v = jnp.concatenate([avg, mx], axis=0)                 # (2*Bn, C)
        w1t = w1t_ref[...].astype(jnp.float32)                 # (C, Cr)
        w2t = w2t_ref[...].astype(jnp.float32)                 # (Cr, C)
        h = jnp.maximum(
            jnp.dot(v, w1t, preferred_element_type=jnp.float32), 0.0)  # (2Bn, Cr)
        y = jnp.dot(h, w2t, preferred_element_type=jnp.float32)        # (2Bn, C)
        attn = jax.nn.sigmoid(y[:bn] + y[bn:])                 # (Bn, C)
        o_ref[...] = jnp.expand_dims(attn, axis=1).astype(o_ref.dtype)


def _choose_tiles(n, c, hw, itemsize, target_bytes=2 * 1024 * 1024):
    """Pick (Bn images per step, Thw spatial tile) aiming at ~2 MiB tiles."""
    per_image = c * hw * itemsize
    if per_image > target_bytes:
        # One image per step; tile the spatial axis in lane-aligned chunks.
        bn = 1
        if hw <= 128:
            thw = hw
        else:
            thw = max(128, ((target_bytes // (c * itemsize)) // 128) * 128)
            thw = min(thw, hw)
    else:
        thw = hw
        bn = max(1, min(n, target_bytes // per_image))
        if n >= 2:
            bn = min(bn, max(1, n // 2))   # keep >=2 parallel steps (megacore)
        while n % bn != 0:                 # avoid padded batch rows
            bn -= 1
    return int(bn), int(thw)


def channel_attention(x, w1, w2):
    """x: (N, C, H, W); w1: (C//r, C); w2: (C, C//r). Returns (N, C, 1, 1)."""
    n, c, h, w = x.shape
    cr = w1.shape[0]
    hw = h * w
    x_r = x.reshape(n, c, hw)

    bn, thw = _choose_tiles(n, c, hw, x.dtype.itemsize)
    nk = pl.cdiv(hw, thw)

    # Pre-transpose the tiny weights once so the kernel does row-major matmuls.
    w1t = jnp.transpose(w1)    # (C, Cr)
    w2t = jnp.transpose(w2)    # (Cr, C)

    # Explicit VMEM budget: double-buffered x tile + weights + output + scratch.
    x_tile_bytes = bn * c * thw * x.dtype.itemsize
    w_bytes = 2 * c * cr * w1.dtype.itemsize
    out_tile_bytes = bn * c * x.dtype.itemsize
    scratch_bytes = 2 * bn * c * 4
    needed = (2 * x_tile_bytes + 2 * w_bytes + 2 * out_tile_bytes
              + scratch_bytes + (2 << 20))
    vmem_limit = int(min(48 << 20, max(16 << 20, needed)))

    kernel = functools.partial(_channel_attention_kernel, hw_total=hw)

    out = pl.pallas_call(
        kernel,
        out_shape=jax.ShapeDtypeStruct((n, 1, c), x.dtype),
        grid_spec=pltpu.PrefetchScalarGridSpec(
            num_scalar_prefetch=0,
            grid=(n // bn, nk),
            in_specs=[
                pl.BlockSpec((bn, c, thw), lambda b, k: (b, 0, k)),
                pl.BlockSpec((c, cr), lambda b, k: (0, 0)),
                pl.BlockSpec((cr, c), lambda b, k: (0, 0)),
            ],
            out_specs=pl.BlockSpec((bn, 1, c), lambda b, k: (b, 0, 0)),
            scratch_shapes=[
                pltpu.VMEM((bn, c), jnp.float32),
                pltpu.VMEM((bn, c), jnp.float32),
            ],
        ),
        compiler_params=pltpu.CompilerParams(
            dimension_semantics=("parallel", "arbitrary"),
            vmem_limit_bytes=vmem_limit,
        ),
    )(x_r, w1t, w2t)
    return out.reshape(n, c, 1, 1)


def channel_attention_ref(x, w1, w2):
    """Plain-JAX reference mirroring the PyTorch forward."""
    avg = jnp.mean(x, axis=(2, 3))                    # (N, C)
    mx = jnp.max(x, axis=(2, 3))                      # (N, C)

    def mlp(v):                                       # v: (N, C)
        h = jnp.maximum(v @ w1.T, 0.0)                # (N, Cr)
        return h @ w2.T                               # (N, C)

    out = jax.nn.sigmoid(mlp(avg) + mlp(mx))
    return out[:, :, None, None]


if __name__ == "__main__":
    # Small shapes consistent with the module: reduction=16 needs C >= 16.
    N, C, H, W = 2, 64, 16, 16
    reduction = 16
    Cr = C // reduction

    key = jax.random.PRNGKey(0)
    kx, k1, k2 = jax.random.split(key, 3)

    x = jax.random.normal(kx, (N, C, H, W), dtype=jnp.float32)
    # PyTorch Conv2d weights are (out_c, in_c, 1, 1); squeeze the 1x1 dims.
    w1 = jax.random.normal(k1, (Cr, C), dtype=jnp.float32) * (1.0 / (C ** 0.5))
    w2 = jax.random.normal(k2, (C, Cr), dtype=jnp.float32) * (1.0 / (Cr ** 0.5))

    out = channel_attention(x, w1, w2)
    out = jax.block_until_ready(out)

    ref = channel_attention_ref(x, w1, w2)
    assert out.shape == (N, C, 1, 1)
    assert jnp.allclose(out, ref, atol=1e-5, rtol=1e-5), "mismatch vs reference"

    print("KERNEL_OK")
</pallas_src>

<mosaic_0001>
module attributes {stable_mosaic.version = 11 : i64} {
  func.func @_channel_attention_kernel(%arg0: i32, %arg1: i32, %arg2: memref<1x64x256xf32, #tpu.memory_space<vmem>>, %arg3: memref<64x4xf32, #tpu.memory_space<vmem>>, %arg4: memref<4x64xf32, #tpu.memory_space<vmem>>, %arg5: memref<1x1x64xf32, #tpu.memory_space<vmem>>, %arg6: memref<1x64xf32, #tpu.memory_space<vmem>>, %arg7: memref<1x64xf32, #tpu.memory_space<vmem>>) attributes {dimension_semantics = [#tpu.dimension_semantics<parallel>, #tpu.dimension_semantics<arbitrary>], iteration_bounds = array<i64: 2, 1>, scalar_prefetch = 0 : i64, scratch_operands = 2 : i64, tpu.core_type = #tpu.core_type<tc>, window_params = [{transform_indices = @transform_0, window_bounds = array<i64: 1, 64, 256>}, {pipeline_mode = #tpu.pipeline_mode<synchronous>, transform_indices = @transform_1, window_bounds = array<i64: 64, 4>}, {pipeline_mode = #tpu.pipeline_mode<synchronous>, transform_indices = @transform_2, window_bounds = array<i64: 4, 64>}, {transform_indices = @transform_3, window_bounds = array<i64: 1, 1, 64>}]} {
    %c0_i32 = arith.constant 0 : i32
    %0 = arith.cmpi eq, %arg1, %c0_i32 : i32
    %1 = arith.extui %0 : i1 to i32
    %c0_i32_0 = arith.constant 0 : i32
    %2 = arith.cmpi ne, %1, %c0_i32_0 : i32
    scf.if %2 {
      %cst_14 = arith.constant 0.000000e+00 : f32
      %15 = vector.broadcast %cst_14 : f32 to vector<1x64xf32>
      %c0_15 = arith.constant 0 : index
      %c0_16 = arith.constant 0 : index
      %16 = vector.load %arg6[%c0_15, %c0_16] : memref<1x64xf32, #tpu.memory_space<vmem>>, vector<1x64xf32>
      tpu.vector_store %arg6[%c0_15, %c0_16], %15 {strides = array<i32>} : memref<1x64xf32, #tpu.memory_space<vmem>>, vector<1x64xf32>,
      %cst_17 = arith.constant 0xFF800000 : f32
      %17 = vector.broadcast %cst_17 : f32 to vector<1x64xf32>
      %c0_18 = arith.constant 0 : index
      %c0_19 = arith.constant 0 : index
      %18 = vector.load %arg7[%c0_18, %c0_19] : memref<1x64xf32, #tpu.memory_space<vmem>>, vector<1x64xf32>
      tpu.vector_store %arg7[%c0_18, %c0_19], %17 {strides = array<i32>} : memref<1x64xf32, #tpu.memory_space<vmem>>, vector<1x64xf32>,
    } else {
    }
    %c0 = arith.constant 0 : index
    %c0_1 = arith.constant 0 : index
    %c0_2 = arith.constant 0 : index
    %3 = vector.load %arg2[%c0, %c0_1, %c0_2] : memref<1x64x256xf32, #tpu.memory_space<vmem>>, vector<1x64x256xf32>
    %c0_3 = arith.constant 0 : index
    %c0_4 = arith.constant 0 : index
    %4 = vector.load %arg6[%c0_3, %c0_4] : memref<1x64xf32, #tpu.memory_space<vmem>>, vector<1x64xf32>
    %cst = arith.constant dense<0.000000e+00> : vector<1x64xf32>
    %5 = vector.multi_reduction <add>, %3, %cst [2] : vector<1x64x256xf32> to vector<1x64xf32>
    %6 = arith.addf %4, %5 : vector<1x64xf32>
    %c0_5 = arith.constant 0 : index
    %c0_6 = arith.constant 0 : index
    %7 = vector.load %arg6[%c0_5, %c0_6] : memref<1x64xf32, #tpu.memory_space<vmem>>, vector<1x64xf32>
    tpu.vector_store %arg6[%c0_5, %c0_6], %6 {strides = array<i32>} : memref<1x64xf32, #tpu.memory_space<vmem>>, vector<1x64xf32>,
    %c0_7 = arith.constant 0 : index
    %c0_8 = arith.constant 0 : index
    %8 = vector.load %arg7[%c0_7, %c0_8] : memref<1x64xf32, #tpu.memory_space<vmem>>, vector<1x64xf32>
    %cst_9 = arith.constant dense<0xFF800000> : vector<1x64xf32>
    %9 = vector.multi_reduction <maximumf>, %3, %cst_9 [2] : vector<1x64x256xf32> to vector<1x64xf32>
    %10 = arith.maximumf %8, %9 : vector<1x64xf32>
    %c0_10 = arith.constant 0 : index
    %c0_11 = arith.constant 0 : index
    %11 = vector.load %arg7[%c0_10, %c0_11] : memref<1x64xf32, #tpu.memory_space<vmem>>, vector<1x64xf32>
    tpu.vector_store %arg7[%c0_10, %c0_11], %10 {strides = array<i32>} : memref<1x64xf32, #tpu.memory_space<vmem>>, vector<1x64xf32>,
    %c0_i32_12 = arith.constant 0 : i32
    %12 = arith.cmpi eq, %arg1, %c0_i32_12 : i32
    %13 = arith.extui %12 : i1 to i32
    %c0_i32_13 = arith.constant 0 : i32
    %14 = arith.cmpi ne, %13, %c0_i32_13 : i32
    scf.if %14 {
      %c0_14 = arith.constant 0 : index
      %c0_15 = arith.constant 0 : index
      %15 = vector.load %arg6[%c0_14, %c0_15] : memref<1x64xf32, #tpu.memory_space<vmem>>, vector<1x64xf32>
      %cst_16 = arith.constant 3.906250e-03 : f32
      %16 = vector.broadcast %cst_16 : f32 to vector<1x64xf32>
      %17 = arith.mulf %15, %16 : vector<1x64xf32>
      %c0_17 = arith.constant 0 : index
      %c0_18 = arith.constant 0 : index
      %18 = vector.load %arg7[%c0_17, %c0_18] : memref<1x64xf32, #tpu.memory_space<vmem>>, vector<1x64xf32>
      %19 = tpu.concatenate %17, %18 in 0 : vector<1x64xf32>, vector<1x64xf32> -> vector<2x64xf32>
      %c0_19 = arith.constant 0 : index
      %c0_20 = arith.constant 0 : index
      %20 = vector.load %arg3[%c0_19, %c0_20] : memref<64x4xf32, #tpu.memory_space<vmem>>, vector<64x4xf32>
      %c0_21 = arith.constant 0 : index
      %c0_22 = arith.constant 0 : index
      %21 = vector.load %arg4[%c0_21, %c0_22] : memref<4x64xf32, #tpu.memory_space<vmem>>, vector<4x64xf32>
      %cst_23 = arith.constant dense<0.000000e+00> : vector<2x4xf32>
      %22 = tpu.matmul %19, %20, %cst_23 {dimension_numbers = #tpu.dot_dimension_numbers<[1], [0], [0], [1], [0, 0, 1, 1], [], []>} : vector<2x64xf32>, vector<64x4xf32>, vector<2x4xf32> -> vector<2x4xf32>
      %cst_24 = arith.constant 0.000000e+00 : f32
      %23 = vector.broadcast %cst_24 : f32 to vector<2x4xf32>
      %24 = arith.maximumf %22, %23 : vector<2x4xf32>
      %cst_25 = arith.constant dense<0.000000e+00> : vector<2x64xf32>
      %25 = tpu.matmul %24, %21, %cst_25 {dimension_numbers = #tpu.dot_dimension_numbers<[1], [0], [0], [1], [0, 0, 1, 1], [], []>} : vector<2x4xf32>, vector<4x64xf32>, vector<2x64xf32> -> vector<2x64xf32>
      %26 = vector.extract_strided_slice %25 {offsets = [0, 0], sizes = [1, 64], strides = [1, 1]} : vector<2x64xf32> to vector<1x64xf32>
      %27 = vector.extract_strided_slice %25 {offsets = [1, 0], sizes = [1, 64], strides = [1, 1]} : vector<2x64xf32> to vector<1x64xf32>
      %28 = arith.addf %26, %27 : vector<1x64xf32>
      %29 = arith.negf %28 : vector<1x64xf32>
      %30 = math.exp %29 : vector<1x64xf32>
      %cst_26 = arith.constant 1.000000e+00 : f32
      %31 = vector.broadcast %cst_26 : f32 to vector<1x64xf32>
      %32 = arith.addf %31, %30 : vector<1x64xf32>
      %33 = arith.divf %31, %32 : vector<1x64xf32>
      %34 = vector.shape_cast %33 : vector<1x64xf32> to vector<1x1x64xf32>
      %c0_27 = arith.constant 0 : index
      %c0_28 = arith.constant 0 : index
      %c0_29 = arith.constant 0 : index
      %35 = vector.load %arg5[%c0_27, %c0_28, %c0_29] : memref<1x1x64xf32, #tpu.memory_space<vmem>>, vector<1x1x64xf32>
      tpu.vector_store %arg5[%c0_27, %c0_28, %c0_29], %34 {strides = array<i32>} : memref<1x1x64xf32, #tpu.memory_space<vmem>>, vector<1x1x64xf32>,
    } else {
    }
    return
  }
  func.func @transform_0(%arg0: i32, %arg1: i32) -> (i32, i32, i32) {
    %c0_i32 = arith.constant 0 : i32
    %c0_i32_0 = arith.constant 0 : i32
    return %arg0, %c0_i32, %arg1 : i32, i32, i32
  }
  func.func @transform_1(%arg0: i32, %arg1: i32) -> (i32, i32) {
    %c0_i32 = arith.constant 0 : i32
    %c0_i32_0 = arith.constant 0 : i32
    %c0_i32_1 = arith.constant 0 : i32
    return %c0_i32, %c0_i32_0 : i32, i32
  }
  func.func @transform_2(%arg0: i32, %arg1: i32) -> (i32, i32) {
    %c0_i32 = arith.constant 0 : i32
    %c0_i32_0 = arith.constant 0 : i32
    %c0_i32_1 = arith.constant 0 : i32
    return %c0_i32, %c0_i32_0 : i32, i32
  }
  func.func @transform_3(%arg0: i32, %arg1: i32) -> (i32, i32, i32) {
    %c0_i32 = arith.constant 0 : i32
    %c0_i32_0 = arith.constant 0 : i32
    %c0_i32_1 = arith.constant 0 : i32
    return %arg0, %c0_i32, %c0_i32_0 : i32, i32, i32
  }
}

</mosaic_0001>

<bundles_post_ra>
// kernel: tpu_custom_call.1
= control target key start
LH: loop header
LB: loop body
LE: loop exit
PB: predicated region body
PF: predicated region fallthrough
CT: control target
= control target key end

     0   :  { %8 = vsyncpa [#allocation5], 0  ;;  %s2811_s0 = inlined_call_operand.hbm [shape: f32[2,64,256], index: 0, kind: input, shape index: {}]   ;;  %s2812_s1 = inlined_call_operand.vmem [shape: f32[64,4], index: 1, kind: input, shape index: {}]   ;;  %s2813_s2 = inlined_call_operand.vmem [shape: f32[4,64], index: 2, kind: input, shape index: {}]   ;;  %s2814_s3 = inlined_call_operand.hbm [shape: f32[2,1,64], index: 3, kind: output, shape index: {}]  }
   0x1   :  { %10 = vsyncpa [#allocation5 + $0x1], 0 }
   0x2   :  { %11 = vsyncpa [#allocation6], 0 }
   0x3   :  { %13 = vsyncpa [#allocation6 + $0x1], 0  ;;  %s2311_s12 = smov 0   ;;  %s2313_s13 = smov 0  }
   0x4   :  { %s2315_s14 = smov 0   ;;  %s2317_s15 = smov 0  }
   0x5   :  { %s2319_s16 = smov 0   ;;  %s2321_s17 = smov 0  }
   0x6 LB: > { %s2044_s18 = sadd.s32 4294967295, %s2280_s17   ;;  %s2045_s19 = sadd.s32 4294967294, %s2280_s17   ;;  %s2280_s17 = sphi %s2321_s17, %s19_s17   ;;  %s2276_s16 = sphi %s2319_s16, %s2825_s16   ;;  %s2272_s15 = sphi %s2317_s15, %s2824_s15   ;;  %s2268_s14 = sphi %s2315_s14, %s2823_s14   ;;  %s2264_s13 = sphi %s2313_s13, %s2822_s13   ;;  %s2260_s12 = sphi %s2311_s12, %s2821_s12  }
   0x7   : > { %s31_s20 = sadd.s32 1, %s2276_s16  ;;  %s40_s21 = sadd.s32 1, %s2268_s14 }
   0x8   : > { %p33_p0 = scmp.ge.s32.totalorder %s31_s20, 2  ;;  %p47_p1 = scmp.ne.s32.totalorder %s2268_s14, %s2264_s13 }
   0x9   : > { %p48_p2 = scmp.eq.s32.totalorder %s2280_s17, 0  ;;  %p53_p3 = scmp.ne.s32.totalorder %s2264_s13, %s2260_s12 }
   0xa   : > { %s2827_s20 = smov (%p33_p0, %s31_s20), 0  ;;  %p54_p5 = scmp.eq.s32.totalorder %s2044_s18, 0 }
   0xb   : > { %p2352_p4 = por %p48_p2, %p47_p1  ;;  %s35_s23 = ssub.s32 %s2276_s16, %s2827_s20 }
   0xc   : > { %p119_p6 = scmp.eq.s32.totalorder %s2044_s18, 1  ;;  %p38_p7 = scmp.eq.s32.totalorder %s35_s23, 0 }
   0xd   : > { %p2358_p8 = por %p54_p5, %p53_p3  ;;  %p125_p10 = scmp.eq.s32.totalorder %s2045_s19, 1 }
   0xe   : > { %p2362_p9 = por %p119_p6, %p47_p1  ;;  %p2109_p13 = scmp.lt.s32.totalorder %s2280_s17, 2 }
   0xf   : > { %s2367_s26 = scalar_select %p38_p7, %s2268_s14, %s40_s21  }
  0x10   : > { %p2369_p11 = por %p125_p10, %p53_p3  ;;  %s151_s28 = sand.u32 1, %s2268_s14  }
  0x11   : > { %s2048_s29 = sshll.u32 %s151_s28, 7  ;;  %s2061_s30 = sshll.u32 %s2276_s16, 11 }
  0x12   : > { %s163_s6 = scalar_lea.hbm %s2811_s0, %s2061_s30  ;;  %s155_s7 = scalar_lea.vmem [#allocation4], %s2048_s29 }
  0x13   : > { %s164_s8 = sshll.u32 %s155_s7, 4  ;;  %p2382_p0 = pnand %p2109_p13, %p2352_p4  ;;  %s165_s8 = int_to_ptr.vmem [resolvable:$true] %s164_s8 }
  0x14   : > { %p2051_p1 = scmp.ge.s32.totalorder %s2280_s17, 1  ;;  %s152_s10 = scalar_lea.sflag [#allocation5], %s151_s28 }
  0x15   : > { %p2174_p2 = pneg %p2382_p0  ;;  %s2185_s11 = scalar_lea.vmem %s165_s8, 2048 }
  0x16   : > { %p2186_p3 = scmp.ne.s32.totalorder %s165_s8, %s2185_s11  ;;  %s2282_s18 = smov [#allocation4]  }
  0x17   : > { %s2190_s19 = sshll.u32 %s2282_s18, 4  ;;  %s2191_s19 = int_to_ptr.vmem [resolvable:$false] %s2190_s19 }
  0x18   : > { %p2188_p5 = pnand %p2186_p3, %p2174_p2  ;;  %s2192_s21 = scalar_lea.vmem %s2191_s19, 4096 }
  0x19   : > { %p2193_p7 = scmp.lt.s32.totalorder %s165_s8, %s2191_s19  ;;  %p2194_p10 = scmp.lt.s32.totalorder %s2192_s21, %s2185_s11 }
  0x1a   : > { %p2189_p6 = pneg %p2188_p5 }
  0x1b   : > { %p2195_p12 = por %p2194_p10, %p2193_p7 }
  0x1d   : > { %p2196_p4 = pnand %p2195_p12, %p2189_p6 }
  0x1f   : > { %2199 = shalt.err (!%p2196_p4)
}
  0x20   : > { %s2283_s22 = smov 256   ;;  %s2284_s23 = smov 16  }
  0x21   : > { %2104 = dma.hbm_to_vmem [thread:$0]  (!%p2382_p0), %s163_s6, 2048, %s165_s8, %s152_s10, %s2283_s22, %s2283_s22, %s2284_s23  }
  0x22   : > { %p172_p13 = scmp.lt.s32.totalorder %s2280_s17, 3 }
  0x24   : > { %p173_p2 = pnand %p2051_p1, %p172_p13 }
  0x25   : > { %s2395_s28 = sand.u32 (!%p173_p2), 1, %s2264_s13  }
  0x26   : > { %176 = sbr.rel (%p173_p2) target bundleno = 856 (0x358), region = 32  ;;  %s2052_s29 = sshll.u32 (!%p173_p2), %s2395_s28, 7 }
  0x27   : > { %s179_s30 = scalar_lea.sflag (!%p173_p2), [#allocation5], %s2395_s28  ;;  %s2399_s4 = scalar_lea.vmem (!%p173_p2), [#allocation4], %s2052_s29 }
  0x2b   : > { %2251 = dma.done.wait (%p2358_p8), %s179_s30, 2048  }
  0x2c   : > { %2253 = vsyncadd (%p2358_p8), %s179_s30, 4294965248  ;;  %v212_v0 = vld [vmem:[%s2399_s4] sm:$0xff]  ;;  %v213_v1 = vld [vmem:[%s2399_s4 + $0x8] sm:$0xff]  ;;  %v2285_v28 = vmov 0   ;;  %v261_v33 = vlaneseq  ;;  %v2286_v34 = vmov 1966171168  }
  0x2d   : > { %v216_v2 = vld [vmem:[%s2399_s4 + $0x20] sm:$0xff]  ;;  %v229_v3 = vadd.f32 %v213_v1, %v212_v0  ;;  %v217_v4 = vld [vmem:[%s2399_s4 + $0x28] sm:$0xff]  ;;  %v214_v5 = vld [vmem:[%s2399_s4 + $0x10] sm:$0xff]  ;;  %v1007_v12 = vmax.f32 %v212_v0, %v213_v1  ;;  %2166 = vset.pattern.permute.xlu0 %v2285_v28  ;;  %2167 = vset.pattern.permute.xlu1 %v2285_v28  ;;  %v522_v35 = vunpack.c.l.s4 %v2286_v34  ;;  %vm209_vm0 = vcmask 516096   ;;  %s2058_s6 = sshll.u32 %s2272_s15, 4  ;;  %s203_s7 = scalar_lea.vmem [#allocation7], %s2395_s28 }
  0x2e   : > { %v215_v6 = vld [vmem:[%s2399_s4 + $0x18] sm:$0xff]  ;;  %v235_v7 = vadd.f32 %v217_v4, %v216_v2  ;;  %v218_v8 = vld [vmem:[%s2399_s4 + $0x30] sm:$0xff]  ;;  %v220_v14 = vld [vmem:[%s2399_s4 + $0x40] sm:$0xff]  ;;  %v1013_v17 = vmax.f32 %v216_v2, %v217_v4  ;;  %v2422_v36 = vshrl.u32 %v261_v33, 7  ;;  %vm2289_vm1 = vmmov 0   ;;  %s1967_s8 = sshll.u32 %s203_s7, 4  ;;  %s2768_s11 = scalar_lea.hbm %s2814_s3, %s2058_s6  ;;  %s1968_s8 = int_to_ptr.vmem [resolvable:$true] %s1967_s8 }
  0x2f   : > { %v219_v9 = vld [vmem:[%s2399_s4 + $0x38] sm:$0xff]  ;;  %230 = vadd.xlane.f32.xlu0 %v229_v3  ;;  %v232_v10 = vadd.f32 %v215_v6, %v214_v5  ;;  %v1010_v13 = vmax.f32 %v214_v5, %v215_v6  ;;  %v221_v15 = vld [vmem:[%s2399_s4 + $0x48] sm:$0xff]  ;;  %v222_v18 = vld [vmem:[%s2399_s4 + $0x50] sm:$0xff]  ;;  %v523_v37 = vunpack.c.0.s8 %v522_v35  ;;  %vm944_vm2 = vcmask 130112   ;;  %s1955_s18 = scalar_lea.sflag [#allocation6], %s2395_s28  ;;  %s2200_s19 = scalar_lea.vmem %s1968_s8, 16 }
  0x30   : > { %236 = vadd.xlane.f32.xlu1 %v235_v7  ;;  %v238_v11 = vadd.f32 %v219_v9, %v218_v8  ;;  %v241_v16 = vadd.f32 %v221_v15, %v220_v14  ;;  %v223_v19 = vld [vmem:[%s2399_s4 + $0x58] sm:$0xff]  ;;  %v1016_v21 = vmax.f32 %v218_v8, %v219_v9  ;;  %v224_v22 = vld [vmem:[%s2399_s4 + $0x60] sm:$0xff]  ;;  %v225_v23 = vld [vmem:[%s2399_s4 + $0x68] sm:$0xff]  ;;  %v1019_v25 = vmax.f32 %v220_v14, %v221_v15  ;;  %p2201_p8 = scmp.ne.s32.totalorder %s1968_s8, %s2200_s19  ;;  %s2290_s21 = smov [#allocation7]  }
  0x31   : > { %v244_v20 = vadd.f32 %v223_v19, %v222_v18  ;;  %v247_v24 = vadd.f32 %v225_v23, %v224_v22  ;;  %v226_v26 = vld [vmem:[%s2399_s4 + $0x70] sm:$0xff]  ;;  %v227_v27 = vld [vmem:[%s2399_s4 + $0x78] sm:$0xff]  ;;  %v1022_v30 = vmax.f32 %v222_v18, %v223_v19  ;;  %v1025_v31 = vmax.f32 %v224_v22, %v225_v23  ;;  %s2204_s22 = sshll.u32 %s2290_s21, 4  ;;  %s2205_s22 = int_to_ptr.vmem [resolvable:$false] %s2204_s22 }
  0x32   : > { %v250_v29 = vadd.f32 %v227_v27, %v226_v26  ;;  %v1028_v32 = vmax.f32 %v226_v26, %v227_v27  ;;  %v2425_v38 = vsub.s32 0, %v2422_v36  ;;  %v2428_v39 = vsub.s32 1, %v2422_v36  ;;  %p2202_p12 = pnand %p2201_p8, %p2362_p9  ;;  %s2206_s15 = scalar_lea.vmem %s2205_s22, 32 }
  0x33   : > { %233 = vadd.xlane.f32.xlu0 %v232_v10  ;;  %v2431_v40 = vsub.s32 2, %v2422_v36  ;;  %v2434_v41 = vsub.s32 3, %v2422_v36  ;;  %v2437_v42 = vsub.s32 4, %v2422_v36  ;;  %v2440_v43 = vsub.s32 5, %v2422_v36  ;;  %p2207_p1 = scmp.lt.s32.totalorder %s1968_s8, %s2205_s22  ;;  %p2208_p3 = scmp.lt.s32.totalorder %s2206_s15, %s2200_s19 }
  0x34   : > { %239 = vadd.xlane.f32.xlu1 %v238_v11  ;;  %v2443_v44 = vsub.s32 6, %v2422_v36  ;;  %v2446_v45 = vsub.s32 7, %v2422_v36  ;;  %v2449_v47 = vsub.s32 %v523_v37, %v2422_v36  ;;  %vm951_vm3 = vcmask 195712   ;;  %p2203_p0 = pneg %p2202_p12 }
  0x35   : > { %vm958_vm4 = vcmask 261312   ;;  %vm965_vm5 = vcmask 326912   ;;  %vm972_vm6 = vcmask 392512   ;;  %vm979_vm7 = vcmask 458112   ;;  %p2209_p5 = por %p2208_p3, %p2207_p1 }
  0x36   : > { %vm986_vm8 = vcmask 523712   ;;  %vm1779_vm9 = vcmask 1040384   ;;  %vm1790_vm10 = vcmask 523264   ;;  %vm1869_vm11 = vcmask 1043456  }
  0x37   : > { %1008 = vmax.xlane.f32.xlu0 %v1007_v12  ;;  %vm1865_vm12 = vcmask 31744   ;;  %p2210_p6 = pnand %p2209_p5, %p2203_p0 }
  0x38   : > { %1011 = vmax.xlane.f32.xlu1 %v1010_v13 }
  0x3b   : > { %242 = vadd.xlane.f32.xlu0 %v241_v16 }
  0x3c   : > { %1014 = vmax.xlane.f32.xlu1 %v1013_v17 }
  0x3f   : > { %245 = vadd.xlane.f32.xlu0 %v244_v20 }
  0x40   : > { %1017 = vmax.xlane.f32.xlu1 %v1016_v21 }
  0x43   : > { %248 = vadd.xlane.f32.xlu0 %v247_v24 }
  0x44   : > { %1020 = vmax.xlane.f32.xlu1 %v1019_v25 }
  0x47   : > { %251 = vadd.xlane.f32.xlu0 %v250_v29 }
  0x48   : > { %1023 = vmax.xlane.f32.xlu1 %v1022_v30 }
  0x4b   : > { %1026 = vmax.xlane.f32.xlu0 %v1025_v31 }
  0x4c   : > { %1029 = vmax.xlane.f32.xlu1 %v1028_v32 }
  0xb8   : > { %v231_v46 = vpop.xlane.xlu0 %230 }
  0xb9   : > { %v237_v48 = vpop.xlane.xlu1 %236  ;;  %v264_v49 = vrot.slane %v231_v46, %v2425_v38  ;;  %v268_v50 = vrot.slane %v231_v46, %v2428_v39  ;;  %v272_v51 = vrot.slane %v231_v46, %v2431_v40  ;;  %v276_v52 = vrot.slane %v231_v46, %v2434_v41 }
  0xba   : > { %v280_v53 = vrot.slane %v231_v46, %v2437_v42  ;;  %v284_v54 = vrot.slane %v231_v46, %v2440_v43  ;;  %v288_v55 = vrot.slane %v231_v46, %v2443_v44  ;;  %v292_v56 = vrot.slane %v231_v46, %v2446_v45 }
  0xbb   : > { %v517_v57 = vcombine.low %v264_v49, %v268_v50  ;;  %v518_v58 = vcombine.low %v272_v51, %v276_v52  ;;  %v328_v59 = vrot.slane %v237_v48, %v2425_v38  ;;  %v332_v60 = vrot.slane %v237_v48, %v2428_v39 }
  0xbc   : > { %v234_v61 = vpop.xlane.xlu0 %233  ;;  %v519_v62 = vcombine.low %v280_v53, %v284_v54  ;;  %v520_v63 = vcombine.low %v288_v55, %v292_v56  ;;  %v336_v0 = vrot.slane %v237_v48, %v2431_v40  ;;  %v340_v1 = vrot.slane %v237_v48, %v2434_v41 }
  0xbd   : > { %v2463_v2 = vpop.xlane.xlu1 %239  ;;  %v527_v3 = vrot.slane %v517_v57, %v2449_v47  ;;  %v534_v4 = vrot.slane %v518_v58, %v2449_v47  ;;  %v296_v5 = vrot.slane %v234_v61, %v2425_v38  ;;  %v300_v6 = vrot.slane %v234_v61, %v2428_v39 }
  0xbe   : > { %v541_v7 = vrot.slane %v519_v62, %v2449_v47  ;;  %v548_v8 = vrot.slane %v520_v63, %v2449_v47  ;;  %v304_v9 = vrot.slane %v234_v61, %v2431_v40  ;;  %v308_v10 = vrot.slane %v234_v61, %v2434_v41 }
  0xbf   : > { %v549_v11 = vcombine.low %v527_v3, %v534_v4  ;;  %v312_v12 = vrot.slane %v234_v61, %v2437_v42  ;;  %v316_v13 = vrot.slane %v234_v61, %v2440_v43  ;;  %v320_v14 = vrot.slane %v234_v61, %v2443_v44 }
  0xc0   : > { %v550_v15 = vcombine.low %v541_v7, %v548_v8  ;;  %v324_v16 = vrot.slane %v234_v61, %v2446_v45  ;;  %v566_v17 = vcombine.low %v296_v5, %v300_v6  ;;  %v567_v18 = vcombine.low %v304_v9, %v308_v10 }
  0xc1   : > { %v2477_v19 = vpop.xlane.xlu1 %1011  ;;  %v557_v20 = vrot.slane %v549_v11, %v2449_v47  ;;  %v568_v21 = vcombine.low %v312_v12, %v316_v13  ;;  %v344_v22 = vrot.slane %v237_v48, %v2437_v42  ;;  %v348_v23 = vrot.slane %v237_v48, %v2440_v43 }
  0xc2   : > { %v564_v24 = vrot.slane %v550_v15, %v2449_v47  ;;  %v569_v25 = vcombine.low %v320_v14, %v324_v16  ;;  %v576_v26 = vrot.slane %v566_v17, %v2449_v47  ;;  %v583_v27 = vrot.slane %v567_v18, %v2449_v47 }
  0xc3   : > { %v590_v28 = vrot.slane %v568_v21, %v2449_v47  ;;  %v352_v29 = vrot.slane %v237_v48, %v2443_v44  ;;  %v356_v30 = vrot.slane %v237_v48, %v2446_v45  ;;  %v615_v31 = vcombine.low %v328_v59, %v332_v60  ;;  %v1009_v60 = vpop.xlane.xlu0 %1008 }
  0xc4   : > { %v565_v32 = vcombine.low %v557_v20, %v564_v24  ;;  %v597_v34 = vrot.slane %v569_v25, %v2449_v47  ;;  %v598_v35 = vcombine.low %v576_v26, %v583_v27  ;;  %v616_v37 = vcombine.low %v336_v0, %v340_v1 }
  0xc5   : > { %v617_v46 = vcombine.low %v344_v22, %v348_v23  ;;  %v618_v49 = vcombine.low %v352_v29, %v356_v30  ;;  %v625_v50 = vrot.slane %v615_v31, %v2449_v47  ;;  %v360_v51 = vrot.slane %v2463_v2, %v2425_v38  ;;  %v2492_v52 = vpop.xlane.xlu1 %1014 }
  0xc6   : > { %910 = vperm.xlu0 %2166, %v565_v32   ;;  %v599_v53 = vcombine.low %v590_v28, %v597_v34  ;;  %v606_v54 = vrot.slane %v598_v35, %v2449_v47  ;;  %v632_v48 = vrot.slane %v616_v37, %v2449_v47  ;;  %v364_v55 = vrot.slane %v2463_v2, %v2428_v39 }
  0xc7   : > { %v639_v56 = vrot.slane %v617_v46, %v2449_v47  ;;  %v646_v57 = vrot.slane %v618_v49, %v2449_v47  ;;  %v368_v58 = vrot.slane %v2463_v2, %v2431_v40  ;;  %v372_v59 = vrot.slane %v2463_v2, %v2434_v41 }
  0xc8   : > { %v613_v61 = vrot.slane %v599_v53, %v2449_v47  ;;  %v647_v62 = vcombine.low %v625_v50, %v632_v48  ;;  %v376_v63 = vrot.slane %v2463_v2, %v2437_v42  ;;  %v380_v0 = vrot.slane %v2463_v2, %v2440_v43 }
  0xc9   : > { %v648_v1 = vcombine.low %v639_v56, %v646_v57  ;;  %v384_v3 = vrot.slane %v2463_v2, %v2443_v44  ;;  %v388_v4 = vrot.slane %v2463_v2, %v2446_v45  ;;  %v664_v5 = vcombine.low %v360_v51, %v364_v55  ;;  %v1018_v14 = vpop.xlane.xlu1 %1017 }
  0xca   : > { %v614_v6 = vcombine.low %v606_v54, %v613_v61  ;;  %v655_v7 = vrot.slane %v647_v62, %v2449_v47  ;;  %v665_v8 = vcombine.low %v368_v58, %v372_v59  ;;  %v666_v9 = vcombine.low %v376_v63, %v380_v0 }
  0xcb   : > { %v662_v10 = vrot.slane %v648_v1, %v2449_v47  ;;  %v667_v11 = vcombine.low %v384_v3, %v388_v4  ;;  %v674_v12 = vrot.slane %v664_v5, %v2449_v47  ;;  %v1042_v13 = vrot.slane %v1009_v60, %v2425_v38 }
  0xcc   : > { %913 = vperm.xlu1 %2167, %v614_v6   ;;  %v681_v15 = vrot.slane %v665_v8, %v2449_v47  ;;  %v688_v16 = vrot.slane %v666_v9, %v2449_v47  ;;  %v1046_v2 = vrot.slane %v1009_v60, %v2428_v39  ;;  %v1050_v17 = vrot.slane %v1009_v60, %v2431_v40 }
  0xcd   : > { %v663_v18 = vcombine.low %v655_v7, %v662_v10  ;;  %v695_v20 = vrot.slane %v667_v11, %v2449_v47  ;;  %v1054_v21 = vrot.slane %v1009_v60, %v2434_v41  ;;  %v1058_v22 = vrot.slane %v1009_v60, %v2437_v42  ;;  %v1021_v8 = vpop.xlane.xlu1 %1020 }
  0xce   : > { %v696_v23 = vcombine.low %v674_v12, %v681_v15  ;;  %v1062_v24 = vrot.slane %v1009_v60, %v2440_v43  ;;  %v1066_v25 = vrot.slane %v1009_v60, %v2443_v44  ;;  %v1070_v26 = vrot.slane %v1009_v60, %v2446_v45 }
  0xcf   : > { %v697_v27 = vcombine.low %v688_v16, %v695_v20  ;;  %v1295_v28 = vcombine.low %v1042_v13, %v1046_v2  ;;  %v1296_v29 = vcombine.low %v1050_v17, %v1054_v21  ;;  %v1138_v30 = vrot.slane %v1018_v14, %v2425_v38 }
  0xd0   : > { %916 = vperm.xlu1 %2167, %v663_v18   ;;  %v704_v31 = vrot.slane %v696_v23, %v2449_v47  ;;  %v1297_v32 = vcombine.low %v1058_v22, %v1062_v24  ;;  %v1298_v34 = vcombine.low %v1066_v25, %v1070_v26  ;;  %v1142_v35 = vrot.slane %v1018_v14, %v2428_v39 }
  0xd1   : > { %v711_v37 = vrot.slane %v697_v27, %v2449_v47  ;;  %v1305_v46 = vrot.slane %v1295_v28, %v2449_v47  ;;  %v1312_v49 = vrot.slane %v1296_v29, %v2449_v47  ;;  %v1146_v50 = vrot.slane %v1018_v14, %v2431_v40 }
  0xd2   : > { %v1319_v51 = vrot.slane %v1297_v32, %v2449_v47  ;;  %v1326_v53 = vrot.slane %v1298_v34, %v2449_v47  ;;  %v1150_v54 = vrot.slane %v1018_v14, %v2434_v41  ;;  %v1154_v48 = vrot.slane %v1018_v14, %v2437_v42  ;;  %v243_v32 = vpop.xlane.xlu0 %242 }
  0xd3   : > { %v712_v55 = vcombine.low %v704_v31, %v711_v37  ;;  %v1327_v56 = vcombine.low %v1305_v46, %v1312_v49  ;;  %v1158_v57 = vrot.slane %v1018_v14, %v2440_v43  ;;  %v1162_v58 = vrot.slane %v1018_v14, %v2443_v44 }
  0xd4   : > { %v1328_v59 = vcombine.low %v1319_v51, %v1326_v53  ;;  %v1166_v60 = vrot.slane %v1018_v14, %v2446_v45  ;;  %v1442_v61 = vcombine.low %v1138_v30, %v1142_v35  ;;  %v1443_v62 = vcombine.low %v1146_v50, %v1150_v54 }
  0xd5   : > { %919 = vperm.xlu1 %2167, %v712_v55   ;;  %v1335_v63 = vrot.slane %v1327_v56, %v2449_v47  ;;  %v1444_v0 = vcombine.low %v1154_v48, %v1158_v57  ;;  %v1074_v1 = vrot.slane %v2477_v19, %v2425_v38  ;;  %v1078_v3 = vrot.slane %v2477_v19, %v2428_v39 }
  0xd6   : > { %v1342_v4 = vrot.slane %v1328_v59, %v2449_v47  ;;  %v1445_v5 = vcombine.low %v1162_v58, %v1166_v60  ;;  %v1452_v6 = vrot.slane %v1442_v61, %v2449_v47  ;;  %v1459_v7 = vrot.slane %v1443_v62, %v2449_v47 }
  0xd7   : > { %v1466_v9 = vrot.slane %v1444_v0, %v2449_v47  ;;  %v1082_v10 = vrot.slane %v2477_v19, %v2431_v40  ;;  %v1086_v11 = vrot.slane %v2477_v19, %v2434_v41  ;;  %v1090_v12 = vrot.slane %v2477_v19, %v2437_v42 }
  0xd8   : > { %v1343_v13 = vcombine.low %v1335_v63, %v1342_v4  ;;  %v1473_v14 = vrot.slane %v1445_v5, %v2449_v47  ;;  %v1474_v15 = vcombine.low %v1452_v6, %v1459_v7  ;;  %v1094_v16 = vrot.slane %v2477_v19, %v2440_v43 }
  0xd9   : > { %v1098_v2 = vrot.slane %v2477_v19, %v2443_v44  ;;  %v1102_v17 = vrot.slane %v2477_v19, %v2446_v45  ;;  %v1344_v18 = vcombine.low %v1074_v1, %v1078_v3  ;;  %v1345_v20 = vcombine.low %v1082_v10, %v1086_v11  ;;  %v1024_v1 = vpop.xlane.xlu1 %1023 }
  0xda   : > { %1688 = vperm.xlu1 %2167, %v1343_v13   ;;  %v1475_v21 = vcombine.low %v1466_v9, %v1473_v14  ;;  %v1482_v22 = vrot.slane %v1474_v15, %v2449_v47  ;;  %v1346_v23 = vcombine.low %v1090_v12, %v1094_v16  ;;  %v1170_v24 = vrot.slane %v1021_v8, %v2425_v38 }
  0xdb   : > { %v1347_v25 = vcombine.low %v1098_v2, %v1102_v17  ;;  %v1354_v26 = vrot.slane %v1344_v18, %v2449_v47  ;;  %v1361_v27 = vrot.slane %v1345_v20, %v2449_v47  ;;  %v1174_v28 = vrot.slane %v1021_v8, %v2428_v39 }
  0xdc   : > { %v1489_v29 = vrot.slane %v1475_v21, %v2449_v47  ;;  %v1368_v19 = vrot.slane %v1346_v23, %v2449_v47  ;;  %v1178_v30 = vrot.slane %v1021_v8, %v2431_v40  ;;  %v1182_v31 = vrot.slane %v1021_v8, %v2434_v41 }
  0xdd   : > { %v1375_v34 = vrot.slane %v1347_v25, %v2449_v47  ;;  %v1376_v35 = vcombine.low %v1354_v26, %v1361_v27  ;;  %v1186_v37 = vrot.slane %v1021_v8, %v2437_v42  ;;  %v1190_v46 = vrot.slane %v1021_v8, %v2440_v43 }
  0xde   : > { %v1490_v49 = vcombine.low %v1482_v22, %v1489_v29  ;;  %v1194_v50 = vrot.slane %v1021_v8, %v2443_v44  ;;  %v1198_v51 = vrot.slane %v1021_v8, %v2446_v45  ;;  %v1491_v53 = vcombine.low %v1170_v24, %v1174_v28 }
  0xdf   : > { %v1377_v54 = vcombine.low %v1368_v19, %v1375_v34  ;;  %v1384_v48 = vrot.slane %v1376_v35, %v2449_v47  ;;  %v1492_v55 = vcombine.low %v1178_v30, %v1182_v31  ;;  %v1493_v56 = vcombine.low %v1186_v37, %v1190_v46 }
  0xe0   : > { %1697 = vperm.xlu0 %2166, %v1490_v49   ;;  %v1494_v57 = vcombine.low %v1194_v50, %v1198_v51  ;;  %v1501_v58 = vrot.slane %v1491_v53, %v2449_v47  ;;  %v392_v59 = vrot.slane %v243_v32, %v2425_v38  ;;  %v396_v60 = vrot.slane %v243_v32, %v2428_v39 }
  0xe1   : > { %v1391_v61 = vrot.slane %v1377_v54, %v2449_v47  ;;  %v1508_v62 = vrot.slane %v1492_v55, %v2449_v47  ;;  %v1515_v63 = vrot.slane %v1493_v56, %v2449_v47  ;;  %v400_v0 = vrot.slane %v243_v32, %v2431_v40 }
  0xe2   : > { %v1522_v3 = vrot.slane %v1494_v57, %v2449_v47  ;;  %v404_v4 = vrot.slane %v243_v32, %v2434_v41  ;;  %v408_v5 = vrot.slane %v243_v32, %v2437_v42  ;;  %v412_v6 = vrot.slane %v243_v32, %v2440_v43 }
  0xe3   : > { %v1392_v7 = vcombine.low %v1384_v48, %v1391_v61  ;;  %v1523_v8 = vcombine.low %v1501_v58, %v1508_v62  ;;  %v416_v9 = vrot.slane %v243_v32, %v2443_v44  ;;  %v420_v10 = vrot.slane %v243_v32, %v2446_v45  ;;  %v1030_v48 = vpop.xlane.xlu1 %1029 }
  0xe4   : > { %v1524_v11 = vcombine.low %v1515_v63, %v1522_v3  ;;  %v713_v12 = vcombine.low %v392_v59, %v396_v60  ;;  %v714_v13 = vcombine.low %v400_v0, %v404_v4  ;;  %v715_v14 = vcombine.low %v408_v5, %v412_v6  ;;  %v246_v4 = vpop.xlane.xlu0 %245 }
  0xe5   : > { %1691 = vperm.xlu1 %2167, %v1392_v7   ;;  %v1531_v15 = vrot.slane %v1523_v8, %v2449_v47  ;;  %v716_v16 = vcombine.low %v416_v9, %v420_v10  ;;  %v1202_v2 = vrot.slane %v1024_v1, %v2425_v38  ;;  %v1206_v17 = vrot.slane %v1024_v1, %v2428_v39 }
  0xe6   : > { %v1538_v18 = vrot.slane %v1524_v11, %v2449_v47  ;;  %v723_v20 = vrot.slane %v713_v12, %v2449_v47  ;;  %v730_v21 = vrot.slane %v714_v13, %v2449_v47  ;;  %v737_v22 = vrot.slane %v715_v14, %v2449_v47 }
  0xe7   : > { %v744_v23 = vrot.slane %v716_v16, %v2449_v47  ;;  %v1210_v24 = vrot.slane %v1024_v1, %v2431_v40  ;;  %v1214_v25 = vrot.slane %v1024_v1, %v2434_v41  ;;  %v1218_v26 = vrot.slane %v1024_v1, %v2437_v42 }
  0xe8   : > { %v1539_v27 = vcombine.low %v1531_v15, %v1538_v18  ;;  %v745_v28 = vcombine.low %v723_v20, %v730_v21  ;;  %v1222_v29 = vrot.slane %v1024_v1, %v2440_v43  ;;  %v1226_v19 = vrot.slane %v1024_v1, %v2443_v44 }
  0xe9   : > { %v746_v30 = vcombine.low %v737_v22, %v744_v23  ;;  %v1230_v31 = vrot.slane %v1024_v1, %v2446_v45  ;;  %v1540_v32 = vcombine.low %v1202_v2, %v1206_v17  ;;  %v1541_v34 = vcombine.low %v1210_v24, %v1214_v25 }
  0xea   : > { %1700 = vperm.xlu0 %2166, %v1539_v27   ;;  %v753_v35 = vrot.slane %v745_v28, %v2449_v47  ;;  %v1542_v37 = vcombine.low %v1218_v26, %v1222_v29  ;;  %v1106_v46 = vrot.slane %v2492_v52, %v2425_v38  ;;  %v1110_v49 = vrot.slane %v2492_v52, %v2428_v39  ;;  %v249_v28 = vpop.xlane.xlu0 %248 }
  0xeb   : > { %v760_v50 = vrot.slane %v746_v30, %v2449_v47  ;;  %v1543_v51 = vcombine.low %v1226_v19, %v1230_v31  ;;  %v1550_v53 = vrot.slane %v1540_v32, %v2449_v47  ;;  %v1557_v54 = vrot.slane %v1541_v34, %v2449_v47 }
  0xec   : > { %v1564_v55 = vrot.slane %v1542_v37, %v2449_v47  ;;  %v1114_v56 = vrot.slane %v2492_v52, %v2431_v40  ;;  %v1118_v57 = vrot.slane %v2492_v52, %v2434_v41  ;;  %v1122_v58 = vrot.slane %v2492_v52, %v2437_v42 }
  0xed   : > { %v761_v59 = vcombine.low %v753_v35, %v760_v50  ;;  %v1571_v60 = vrot.slane %v1543_v51, %v2449_v47  ;;  %v1572_v61 = vcombine.low %v1550_v53, %v1557_v54  ;;  %v1126_v62 = vrot.slane %v2492_v52, %v2440_v43 }
  0xee   : > { %v1130_v63 = vrot.slane %v2492_v52, %v2443_v44  ;;  %v1134_v0 = vrot.slane %v2492_v52, %v2446_v45  ;;  %v1393_v1 = vcombine.low %v1106_v46, %v1110_v49  ;;  %v1394_v3 = vcombine.low %v1114_v56, %v1118_v57 }
  0xef   : > { %922 = vperm.xlu1 %2167, %v761_v59   ;;  %v1573_v5 = vcombine.low %v1564_v55, %v1571_v60  ;;  %v1580_v6 = vrot.slane %v1572_v61, %v2449_v47  ;;  %v1395_v7 = vcombine.low %v1122_v58, %v1126_v62  ;;  %v1266_v8 = vrot.slane %v1030_v48, %v2425_v38 }
  0xf0   : > { %v1396_v9 = vcombine.low %v1130_v63, %v1134_v0  ;;  %v1403_v10 = vrot.slane %v1393_v1, %v2449_v47  ;;  %v1410_v11 = vrot.slane %v1394_v3, %v2449_v47  ;;  %v1270_v12 = vrot.slane %v1030_v48, %v2428_v39  ;;  %v252_v0 = vpop.xlane.xlu0 %251 }
  0xf1   : > { %v1587_v13 = vrot.slane %v1573_v5, %v2449_v47  ;;  %v1417_v52 = vrot.slane %v1395_v7, %v2449_v47  ;;  %v1274_v14 = vrot.slane %v1030_v48, %v2431_v40  ;;  %v1278_v15 = vrot.slane %v1030_v48, %v2434_v41 }
  0xf2   : > { %v1424_v16 = vrot.slane %v1396_v9, %v2449_v47  ;;  %v1425_v2 = vcombine.low %v1403_v10, %v1410_v11  ;;  %v1282_v17 = vrot.slane %v1030_v48, %v2437_v42  ;;  %v1286_v18 = vrot.slane %v1030_v48, %v2440_v43 }
  0xf3   : > { %v1588_v20 = vcombine.low %v1580_v6, %v1587_v13  ;;  %v1290_v21 = vrot.slane %v1030_v48, %v2443_v44  ;;  %v1294_v22 = vrot.slane %v1030_v48, %v2446_v45  ;;  %v1638_v23 = vcombine.low %v1266_v8, %v1270_v12 }
  0xf4   : > { %v1426_v24 = vcombine.low %v1417_v52, %v1424_v16  ;;  %v1433_v25 = vrot.slane %v1425_v2, %v2449_v47  ;;  %v1639_v26 = vcombine.low %v1274_v14, %v1278_v15  ;;  %v1640_v27 = vcombine.low %v1282_v17, %v1286_v18 }
  0xf5   : > { %1703 = vperm.xlu0 %2166, %v1588_v20   ;;  %v1641_v29 = vcombine.low %v1290_v21, %v1294_v22  ;;  %v1648_v19 = vrot.slane %v1638_v23, %v2449_v47  ;;  %v424_v30 = vrot.slane %v246_v4, %v2425_v38  ;;  %v428_v31 = vrot.slane %v246_v4, %v2428_v39 }
  0xf6   : > { %v1440_v32 = vrot.slane %v1426_v24, %v2449_v47  ;;  %v1655_v34 = vrot.slane %v1639_v26, %v2449_v47  ;;  %v1662_v35 = vrot.slane %v1640_v27, %v2449_v47  ;;  %v432_v37 = vrot.slane %v246_v4, %v2431_v40 }
  0xf7   : > { %v1669_v46 = vrot.slane %v1641_v29, %v2449_v47  ;;  %v436_v49 = vrot.slane %v246_v4, %v2434_v41  ;;  %v440_v50 = vrot.slane %v246_v4, %v2437_v42  ;;  %v444_v51 = vrot.slane %v246_v4, %v2440_v43 }
  0xf8   : > { %v1441_v53 = vcombine.low %v1433_v25, %v1440_v32  ;;  %v1670_v54 = vcombine.low %v1648_v19, %v1655_v34  ;;  %v448_v48 = vrot.slane %v246_v4, %v2443_v44  ;;  %v452_v55 = vrot.slane %v246_v4, %v2446_v45  ;;  %v1027_v25 = vpop.xlane.xlu0 %1026 }
  0xf9   : > { %v1671_v56 = vcombine.low %v1662_v35, %v1669_v46  ;;  %v762_v57 = vcombine.low %v424_v30, %v428_v31  ;;  %v763_v58 = vcombine.low %v432_v37, %v436_v49  ;;  %v764_v59 = vcombine.low %v440_v50, %v444_v51 }
  0xfa   : > { %1694 = vperm.xlu1 %2167, %v1441_v53   ;;  %v1678_v60 = vrot.slane %v1670_v54, %v2449_v47  ;;  %v765_v61 = vcombine.low %v448_v48, %v452_v55  ;;  %v456_v62 = vrot.slane %v249_v28, %v2425_v38  ;;  %v460_v63 = vrot.slane %v249_v28, %v2428_v39 }
  0xfb   : > { %v1685_v1 = vrot.slane %v1671_v56, %v2449_v47  ;;  %v772_v3 = vrot.slane %v762_v57, %v2449_v47  ;;  %v779_v5 = vrot.slane %v763_v58, %v2449_v47  ;;  %v786_v4 = vrot.slane %v764_v59, %v2449_v47 }
  0xfc   : > { %v793_v6 = vrot.slane %v765_v61, %v2449_v47  ;;  %v464_v7 = vrot.slane %v249_v28, %v2431_v40  ;;  %v468_v8 = vrot.slane %v249_v28, %v2434_v41  ;;  %v472_v9 = vrot.slane %v249_v28, %v2437_v42 }
  0xfd   : > { %v1686_v10 = vcombine.low %v1678_v60, %v1685_v1  ;;  %v794_v11 = vcombine.low %v772_v3, %v779_v5  ;;  %v476_v12 = vrot.slane %v249_v28, %v2440_v43  ;;  %v480_v13 = vrot.slane %v249_v28, %v2443_v44 }
  0xfe   : > { %v795_v52 = vcombine.low %v786_v4, %v793_v6  ;;  %v484_v14 = vrot.slane %v249_v28, %v2446_v45  ;;  %v811_v15 = vcombine.low %v456_v62, %v460_v63  ;;  %v812_v16 = vcombine.low %v464_v7, %v468_v8 }
  0xff   : > { %1709 = vperm.xlu0 %2166, %v1686_v10   ;;  %v802_v2 = vrot.slane %v794_v11, %v2449_v47  ;;  %v813_v17 = vcombine.low %v472_v9, %v476_v12  ;;  %v488_v18 = vrot.slane %v252_v0, %v2425_v38  ;;  %v492_v20 = vrot.slane %v252_v0, %v2428_v39 }
 0x100   : > { %v809_v21 = vrot.slane %v795_v52, %v2449_v47  ;;  %v814_v22 = vcombine.low %v480_v13, %v484_v14  ;;  %v821_v23 = vrot.slane %v811_v15, %v2449_v47  ;;  %v828_v24 = vrot.slane %v812_v16, %v2449_v47  ;;  %v1788_v15 = vld [vmem:[%s2812_s1 + $0x38] sm:$0xff]  ;;  %v1787_v16 = vld [vmem:[%s2812_s1 + $0x30] sm:$0xff] }
 0x101   : > { %v835_v26 = vrot.slane %v813_v17, %v2449_v47  ;;  %v496_v27 = vrot.slane %v252_v0, %v2431_v40  ;;  %v500_v28 = vrot.slane %v252_v0, %v2434_v41  ;;  %v504_v29 = vrot.slane %v252_v0, %v2437_v42  ;;  %v1785_v17 = vld [vmem:[%s2812_s1 + $0x20] sm:$0xff] }
 0x102   : > { %v810_v19 = vcombine.low %v802_v2, %v809_v21  ;;  %v842_v30 = vrot.slane %v814_v22, %v2449_v47  ;;  %v843_v31 = vcombine.low %v821_v23, %v828_v24  ;;  %v508_v32 = vrot.slane %v252_v0, %v2440_v43  ;;  %v1786_v2 = vld [vmem:[%s2812_s1 + $0x28] sm:$0xff]  ;;  %v1781_v22 = vld [vmem:[%s2812_s1] sm:$0xff] }
 0x103   : > { %v512_v34 = vrot.slane %v252_v0, %v2443_v44  ;;  %v516_v35 = vrot.slane %v252_v0, %v2446_v45  ;;  %v860_v37 = vcombine.low %v488_v18, %v492_v20  ;;  %v861_v46 = vcombine.low %v496_v27, %v500_v28  ;;  %v1784_v18 = vld [vmem:[%s2812_s1 + $0x18] sm:$0xff]  ;;  %v1783_v20 = vld [vmem:[%s2812_s1 + $0x10] sm:$0xff]  ;;  %v1782_v21 = vld [vmem:[%s2812_s1 + $0x8] sm:$0xff] }
 0x104   : > { %925 = vperm.xlu1 %2167, %v810_v19   ;;  %v844_v49 = vcombine.low %v835_v26, %v842_v30  ;;  %v851_v50 = vrot.slane %v843_v31, %v2449_v47  ;;  %v862_v51 = vcombine.low %v504_v29, %v508_v32  ;;  %v1234_v53 = vrot.slane %v1027_v25, %v2425_v38 }
 0x105   : > { %v863_v54 = vcombine.low %v512_v34, %v516_v35  ;;  %v870_v48 = vrot.slane %v860_v37, %v2449_v47  ;;  %v877_v55 = vrot.slane %v861_v46, %v2449_v47  ;;  %v1238_v56 = vrot.slane %v1027_v25, %v2428_v39 }
 0x106   : > { %v858_v57 = vrot.slane %v844_v49, %v2449_v47  ;;  %v884_v58 = vrot.slane %v862_v51, %v2449_v47  ;;  %v1242_v59 = vrot.slane %v1027_v25, %v2431_v40  ;;  %v1246_v60 = vrot.slane %v1027_v25, %v2434_v41 }
 0x107   : > { %v891_v61 = vrot.slane %v863_v54, %v2449_v47  ;;  %v892_v62 = vcombine.low %v870_v48, %v877_v55  ;;  %v1250_v38 = vrot.slane %v1027_v25, %v2437_v42  ;;  %v1254_v63 = vrot.slane %v1027_v25, %v2440_v43 }
 0x108   : > { %v859_v0 = vcombine.low %v851_v50, %v858_v57  ;;  %v1258_v1 = vrot.slane %v1027_v25, %v2443_v44  ;;  %v1262_v39 = vrot.slane %v1027_v25, %v2446_v45  ;;  %v1589_v3 = vcombine.low %v1234_v53, %v1238_v56 }
 0x109   : > { %v893_v5 = vcombine.low %v884_v58, %v891_v61  ;;  %v900_v4 = vrot.slane %v892_v62, %v2449_v47  ;;  %v1590_v6 = vcombine.low %v1242_v59, %v1246_v60  ;;  %v1591_v40 = vcombine.low %v1250_v38, %v1254_v63 }
 0x10a   : > { %928 = vperm.xlu1 %2167, %v859_v0   ;;  %v1592_v41 = vcombine.low %v1258_v1, %v1262_v39  ;;  %v1599_v7 = vrot.slane %v1589_v3, %v2449_v47  ;;  %v2287_v52 = vmov 0.0   ;;  %v2288_v14 = vmov -inf  }
 0x10b   : > { %v907_v8 = vrot.slane %v893_v5, %v2449_v47  ;;  %v1606_v42 = vrot.slane %v1590_v6, %v2449_v47  ;;  %v1613_v43 = vrot.slane %v1591_v40, %v2449_v47  ;;  %210 = vst.msk [vmem:[#allocation2] sm:$0x1] %vm209_vm0, %v2287_v52  ;;  %2073 = vmatprep.subr.mxu0 %v2287_v52  ;;  %211 = vst.msk [vmem:[#allocation3] sm:$0x1] %vm209_vm0, %v2288_v14 }
 0x10c   : > { %v1620_v44 = vrot.slane %v1592_v41, %v2449_v47  ;;  %2092 = vmatprep.subr.mxu1 %v2287_v52  ;;  %2074 = vmatpush3.msra.mxu0 %v1788_v15  ;;  %v934_v19 = vand.u32 127, %v261_v33 }
 0x10d   : > { %v908_v9 = vcombine.low %v900_v4, %v907_v8  ;;  %v1621_v45 = vcombine.low %v1599_v7, %v1606_v42  ;;  %2075 = vmatprep.subr.mxu0 %v2287_v52  ;;  %2089 = vmatprep.mubr.msk.f32.mxu0 %vm2289_vm1, %v2287_v52 }
 0x10e   : > { %v1622_v10 = vcombine.low %v1613_v43, %v1620_v44  ;;  %2076 = vmatpush3.msra.mxu0 %v1787_v16  ;;  %2094 = vmatprep.mubr.msk.f32.mxu1 %vm2289_vm1, %v2287_v52  ;;  %v939_v31 = vadd.s32 4294967288, %v934_v19  ;;  %v946_v32 = vadd.s32 4294967280, %v934_v19  ;;  %v953_v35 = vadd.s32 4294967272, %v934_v19 }
 0x10f   : > { %931 = vperm.xlu1 %2167, %v908_v9   ;;  %v1629_v11 = vrot.slane %v1621_v45, %v2449_v47  ;;  %2077 = vmatprep.subr.mxu0 %v2287_v52  ;;  %v960_v37 = vadd.s32 4294967264, %v934_v19  ;;  %v974_v51 = vadd.s32 4294967248, %v934_v19  ;;  %v937_v53 = vsub.s32 %v934_v19, %v2422_v36 }
 0x110   : > { %v1636_v12 = vrot.slane %v1622_v10, %v2449_v47  ;;  %2078 = vmatpush3.msra.mxu0 %v1786_v2  ;;  %v942_v46 = vsub.s32 %v939_v31, %v2422_v36  ;;  %v949_v50 = vsub.s32 %v946_v32, %v2422_v36  ;;  %v956_v54 = vsub.s32 %v953_v35, %v2422_v36 }
 0x111   : > { %2079 = vmatprep.subr.mxu0 %v2287_v52  ;;  %v967_v48 = vadd.s32 4294967256, %v934_v19  ;;  %v963_v55 = vsub.s32 %v960_v37, %v2422_v36  ;;  %v981_v60 = vadd.s32 4294967240, %v934_v19  ;;  %v977_v61 = vsub.s32 %v974_v51, %v2422_v36 }
 0x112   : > { %v1637_v13 = vcombine.low %v1629_v11, %v1636_v12  ;;  %2080 = vmatpush3.msra.mxu0 %v1785_v17  ;;  %v228_v2 = vld [vmem:[#allocation2] sm:$0x1] }
 0x113   : > { %2081 = vmatprep.subr.mxu0 %v2287_v52  ;;  %v970_v0 = vsub.s32 %v967_v48, %v2422_v36  ;;  %v984_v43 = vsub.s32 %v981_v60, %v2422_v36 }
 0x114   : > { %1706 = vperm.xlu1 %2167, %v1637_v13   ;;  %2082 = vmatpush3.msra.mxu0 %v1784_v18 }
 0x115   : > { %2083 = vmatprep.subr.mxu0 %v2287_v52 }
 0x116   : > { %2084 = vmatpush3.msra.mxu0 %v1783_v20 }
 0x117   : > { %2085 = vmatprep.subr.mxu0 %v2287_v52 }
 0x118   : > { %2086 = vmatpush3.msra.mxu0 %v1782_v21 }
 0x119   : > { %2087 = vmatprep.subr.mxu0 %v2287_v52 }
 0x11a   : > { %2088 = vmatpush3.msra.mxu0 %v1781_v22 }
 0x141   : > { %v911_v29 = vpop.permute.xlu0 %910 }
 0x142   : > { %v938_v62 = vrot.slane %v911_v29, %v937_v53 }
 0x147   : > { %v914_v23 = vpop.permute.xlu1 %913 }
 0x148   : > { %v943_v56 = vrot.slane %v914_v23, %v942_v46 }
 0x14a   : > { %v945_v3 = vsel %vm944_vm2, %v943_v56, %v938_v62 }
 0x14b   : > { %v917_v24 = vpop.permute.xlu1 %916 }
 0x14c   : > { %v950_v58 = vrot.slane %v917_v24, %v949_v50 }
 0x14e   : > { %v952_v40 = vsel %vm951_vm3, %v950_v58, %v945_v3 }
 0x150   : > { %v920_v25 = vpop.permute.xlu1 %919 }
 0x151   : > { %v957_v38 = vrot.slane %v920_v25, %v956_v54 }
 0x153   : > { %v959_v42 = vsel %vm958_vm4, %v957_v38, %v952_v40 }
 0x155   : > { %v1689_v26 = vpop.permute.xlu1 %1688 }
 0x156   : > { %v1714_v63 = vrot.slane %v1689_v26, %v937_v53 }
 0x15b   : > { %v1698_v34 = vpop.permute.xlu0 %1697 }
 0x15c   : > { %v1728_v5 = vrot.slane %v1698_v34, %v956_v54  ;;  %v1789_v34 = vld [vmem:[%s2813_s2] sm:$0xf] }
 0x15d   : > { %2093 = vmatpush3.msk.msra.mxu1 %vm1869_vm11, %v1789_v34 }
 0x160   : > { %v1692_v27 = vpop.permute.xlu1 %1691 }
 0x161   : > { %v1718_v57 = vrot.slane %v1692_v27, %v942_v46  ;;  %v1006_v27 = vld [vmem:[#allocation3] sm:$0x1] }
 0x163   : > { %v1719_v4 = vsel %vm944_vm2, %v1718_v57, %v1714_v63 }
 0x165   : > { %v1701_v33 = vpop.permute.xlu0 %1700 }
 0x166   : > { %v1733_v44 = vrot.slane %v1701_v33, %v963_v55 }
 0x16a   : > { %v923_v28 = vpop.permute.xlu1 %922 }
 0x16b   : > { %v964_v39 = vrot.slane %v923_v28, %v963_v55 }
 0x16d   : > { %v966_v9 = vsel %vm965_vm5, %v964_v39, %v959_v42 }
 0x170   : > { %v1704_v41 = vpop.permute.xlu0 %1703 }
 0x171   : > { %v1738_v16 = vrot.slane %v1704_v41, %v970_v0 }
 0x175   : > { %v1695_v30 = vpop.permute.xlu1 %1694 }
 0x176   : > { %v1723_v59 = vrot.slane %v1695_v30, %v949_v50 }
 0x178   : > { %v1724_v7 = vsel %vm951_vm3, %v1723_v59, %v1719_v4 }
 0x179   : > { %v1729_v10 = vsel %vm958_vm4, %v1728_v5, %v1724_v7 }
 0x17a   : > { %v1710_v14 = vpop.permute.xlu0 %1709  ;;  %v1734_v36 = vsel %vm965_vm5, %v1733_v44, %v1729_v10 }
 0x17b   : > { %v1748_v21 = vrot.slane %v1710_v14, %v984_v43  ;;  %v1739_v22 = vsel %vm972_vm6, %v1738_v16, %v1734_v36 }
 0x17f   : > { %v926_v49 = vpop.permute.xlu1 %925 }
 0x180   : > { %v971_v6 = vrot.slane %v926_v49, %v970_v0 }
 0x182   : > { %v973_v11 = vsel %vm972_vm6, %v971_v6, %v966_v9 }
 0x185   : > { %v929_v1 = vpop.permute.xlu1 %928 }
 0x186   : > { %v978_v8 = vrot.slane %v929_v1, %v977_v61 }
 0x188   : > { %v980_v13 = vsel %vm979_vm7, %v978_v8, %v973_v11 }
 0x18a   : > { %v932_v45 = vpop.permute.xlu1 %931 }
 0x18b   : > { %v985_v12 = vrot.slane %v932_v45, %v984_v43 }
 0x18d   : > { %v987_v52 = vsel %vm986_vm8, %v985_v12, %v980_v13 }
 0x18e   : > { %v994_v15 = vrot.slane %v987_v52, %v2449_v47 }
 0x18f   : > { %v1707_v17 = vpop.permute.xlu1 %1706 }
 0x190   : > { %v1001_v18 = vrot.slane %v994_v15, %v2449_v47  ;;  %v1743_v20 = vrot.slane %v1707_v17, %v977_v61 }
 0x192   : > { %v1003_v23 = vadd.f32 %v1001_v18, %v228_v2  ;;  %v1744_v24 = vsel %vm979_vm7, %v1743_v20, %v1739_v22 }
 0x193   : > { %v1749_v25 = vsel %vm986_vm8, %v1748_v21, %v1744_v24 }
 0x194   : > { %1005 = vst.msk [vmem:[#allocation2] sm:$0x1] %vm209_vm0, %v1003_v23  ;;  %v1756_v26 = vrot.slane %v1749_v25, %v2449_v47 }
 0x196   : > { %v1763_v28 = vrot.slane %v1756_v26, %v2449_v47 }
 0x198   : > { %v1765_v29 = vmax.f32 %v1006_v27, %v1763_v28 }
 0x19a   : > { %1766 = vst.msk [vmem:[#allocation3] sm:$0x1] %vm209_vm0, %v1765_v29 }
 0x19b   : > { %v1770_v19 = vld [vmem:[#allocation2] sm:$0x1] }
 0x19c   : > { %v1771_v30 = vmul.f32 0.00390625, %v1770_v19 }
 0x1a1   : > { %v2053_v31 = vld [vmem:[#allocation3] ss:$0 sm:$0xff] }
 0x1a2   : > { %v1780_v32 = vsel %vm1779_vm9, %v1771_v30, %v2053_v31 }
 0x1a3   : > { %2090 = vmatmul.mubr.msk.f32.vlgmr.msra.gmra.mxu0 %vm1790_vm10, %v1780_v32 }
 0x263   : > { %v1860_v35 = vpop.f32.mrf.mxu0 }
 0x264   : > { %v1864_v47 = vmax.f32 %v1860_v35, 0.0 }
 0x265   : > { %v2091_v37 = vpop.f32.mrf.mxu0 }
 0x266   : > { %2095 = vmatmul.mubr.msk.f32.vlgmr.msra.gmra.mxu1 %vm1865_vm12, %v1864_v47 }
 0x326   : > { %v1939_v46 = vpop.f32.mrf.mxu1 }
 0x327   : > { %v1944_v49 = vrot.slane %v1939_v46, 1 }
 0x328   : > { %v2096_v50 = vpop.f32.mrf.mxu1 }
 0x329   : > { %v1946_v51 = vadd.f32 %v1944_v49, %v1939_v46 }
 0x32b   : > { %v2057_v53 = vmul.f32 -1.442695, %v1946_v51 }
 0x32d   : > { %2168 = vpow2.f32 %v2057_v53 }
 0x33a   : > { %v2169_v54 = vpop.eup %2168 }
 0x33b   : > { %v1950_v48 = vadd.f32 1.0, %v2169_v54 }
 0x33d   : > { %2170 = vrcp.f32 %v1950_v48 }
 0x34a   : > { %v2171_v55 = vpop.eup %2170 }
 0x34b   : > { %1953 = vst.msk [vmem:[%s203_s7] sm:$0x1] %vm209_vm0, %v2171_v55 }
 0x34c   : > { %2213 = shalt.err (!%p2210_p6)
}
 0x34d   : > { %s2214_s23 = scalar_lea.hbm %s2768_s11, 16  ;;  %s2218_s30 = scalar_lea.hbm %s2814_s3, 32 }
 0x34e   : > { %p2215_p7 = scmp.ne.s32.totalorder %s2768_s11, %s2214_s23  ;;  %p2219_p13 = scmp.lt.s32.totalorder %s2768_s11, %s2814_s3 }
 0x34f   : > { %p2220_p2 = scmp.lt.s32.totalorder %s2218_s30, %s2214_s23 }
 0x350   : > { %p2216_p10 = pnand %p2215_p7, %p2362_p9 }
 0x351   : > { %p2221_p8 = por %p2220_p2, %p2219_p13 }
 0x352   : > { %p2217_p4 = pneg %p2216_p10 }
 0x354   : > { %p2222_p12 = pnand %p2221_p8, %p2217_p4 }
 0x356   : > { %2225 = shalt.err (!%p2222_p12)
}
 0x357   : > { %2099 = dma.vmem_to_hbm [thread:$0]  (%p2362_p9), %s1968_s8, 16, %s2768_s11, %s1955_s18  }
 0x358 PF: > { %s1979_s5 = sand.u32 1, %s2260_s12   ;;  %p2820_p0 = scmp.ge.s32.totalorder %s2280_s17, 2 }
 0x359   : > { %s1980_s6 = scalar_lea.sflag [#allocation6], %s1979_s5 }
 0x35a   : > { %p2106_p1 = pnand %p2820_p0, %p2369_p11 }
 0x35c   : > { %p2107_p3 = pneg %p2106_p1 }
 0x35e   : > { %2255 = dma.done.wait (%p2107_p3), %s1980_s6, 16  }
 0x35f   : > { %2257 = vsyncadd (%p2107_p3), %s1980_s6, 4294967280  ;;  %s19_s17 = sadd.s32 1, %s2280_s17   ;;  %s2821_s12 = smov %s2264_s13 }
 0x360   : > { %p16_p5 = scmp.ge.s32.totalorder %s19_s17, 4   ;;  %s2822_s13 = smov %s2268_s14 }
 0x361   : > { %s2823_s14 = smov %s2367_s26  ;;  %s2824_s15 = smov %s2276_s16 }
 0x362   : > { %s2825_s16 = smov %s2827_s20  ;;  %18 = sbr.rel (!%p16_p5) target bundleno = 6 (0x6), region = 85 }
 0x367   :  { %1984 = vsyncpa [#allocation5], 1 }
 0x368   :  { %1986 = vsyncpa [#allocation5 + $0x1], 1 }
 0x369   :  { %1987 = vsyncpa [#allocation6], 1 }
 0x36a   :  { %1989 = vsyncpa [#allocation6 + $0x1], 1 }

</bundles_post_ra>
